<compile_context>
chip_gen: v6e
topology: v6e:2x2x1
jax: 0.10.0
libtpu: 0.0.40
codegen_flags: <defaults>
</compile_context>

<pallas_src>
import functools

import jax
import jax.numpy as jnp
import numpy as np
from jax.experimental import pallas as pl
from jax.experimental.pallas import tpu as pltpu


def _ln_body(x_ref, w_ref, b_ref, o_ref, *, hidden, eps, mean_center):
    """Normalize a (tile, H) slab of rows.  b_ref may be None (no bias)."""
    x = x_ref[...]
    xf = x.astype(jnp.float32)                       # hidden_states.float()

    # Global (cross-shard) statistics: mean and unbiased variance over H.
    # Identical to variance_formula(ms, vs, g, k) for equal shard sizes.
    mean = jnp.mean(xf, axis=-1, keepdims=True)
    diff = xf - mean
    var = jnp.sum(diff * diff, axis=-1, keepdims=True) * (1.0 / (hidden - 1))
    denom = jax.lax.rsqrt(var + eps)                 # torch.rsqrt(variance + eps)

    if mean_center:
        h = diff * denom
    else:
        h = xf * denom

    out = w_ref[...].astype(jnp.float32) * h
    if b_ref is not None:
        out = out + b_ref[...].astype(jnp.float32)
    o_ref[...] = out.astype(o_ref.dtype)


def _ln_kernel_bias(x_ref, w_ref, b_ref, o_ref, *, hidden, eps, mean_center):
    _ln_body(x_ref, w_ref, b_ref, o_ref, hidden=hidden, eps=eps,
             mean_center=mean_center)


def _ln_kernel_nobias(x_ref, w_ref, o_ref, *, hidden, eps, mean_center):
    _ln_body(x_ref, w_ref, None, o_ref, hidden=hidden, eps=eps,
             mean_center=mean_center)


def synced_model_parallel_fused_layer_norm(
    x, weight_full, bias_full=None, *, mp_size, eps=1e-5,
    mean_center=True, use_bias=True,
):
    """x: (batch, seq, hidden_full).  weight_full/bias_full: (hidden_full,)
    = concatenation of each worker's (partition_size,) parameters."""
    B, S, H = x.shape
    assert H % mp_size == 0
    assert H > 1, "need at least 2 hidden elements for unbiased variance"
    rows = B * S

    x2 = x.reshape(rows, H)
    w2 = weight_full.reshape(1, H).astype(jnp.float32)

    itemsize = jnp.dtype(x.dtype).itemsize
    # Row tile sized so one (tile, H) input slab is ~8 MiB, clamped to the
    # (rounded-up) row count, multiple of 8, at least 8.
    target_slab_bytes = 8 * 1024 * 1024
    rows_up = ((rows + 7) // 8) * 8
    tile = max(8, min((target_slab_bytes // (H * itemsize)) // 8 * 8, rows_up))
    grid = (pl.cdiv(rows, tile),)

    # Double-buffered x input + output, plus (1, H) params, plus headroom.
    needed = 2 * tile * H * itemsize + 2 * tile * H * itemsize + 4 * H * 4
    vmem_limit = max(32 * 1024 * 1024, int(needed * 1.25))

    in_specs = [
        pl.BlockSpec((tile, H), lambda i: (i, 0)),   # x rows
        pl.BlockSpec((1, H), lambda i: (0, 0)),      # weight (resident)
    ]
    operands = [x2, w2]
    if use_bias:
        assert bias_full is not None
        in_specs.append(pl.BlockSpec((1, H), lambda i: (0, 0)))
        operands.append(bias_full.reshape(1, H).astype(jnp.float32))
        kernel = functools.partial(_ln_kernel_bias, hidden=H, eps=eps,
                                   mean_center=mean_center)
    else:
        kernel = functools.partial(_ln_kernel_nobias, hidden=H, eps=eps,
                                   mean_center=mean_center)

    out2 = pl.pallas_call(
        kernel,
        out_shape=jax.ShapeDtypeStruct((rows, H), x.dtype),
        grid_spec=pltpu.PrefetchScalarGridSpec(
            num_scalar_prefetch=0,
            grid=grid,
            in_specs=in_specs,
            out_specs=pl.BlockSpec((tile, H), lambda i: (i, 0)),
        ),
        compiler_params=pltpu.CompilerParams(
            dimension_semantics=("parallel",),
            vmem_limit_bytes=vmem_limit,
        ),
    )(*operands)

    return out2.reshape(B, S, H)


def _reference(x, w, b, mp_size, eps, mean_center, use_bias):
    """Numpy re-derivation of the distributed forward (all workers concatenated),
    using the shard-wise statistics + variance_formula exactly as in torch."""
    x = np.asarray(x, dtype=np.float32)
    B, S, H = x.shape
    k = H // mp_size
    g = mp_size
    shards = x.reshape(B, S, g, k)
    means = shards.mean(-1, keepdims=True)                       # local means
    lvars = shards.var(-1, keepdims=True, ddof=1)                # unbiased local var
    var_ej = means.var(2, keepdims=True, ddof=1)                 # means.var(0)
    summation = lvars.sum(2, keepdims=True)                      # vs.sum(0)
    d = g * k
    inner = k * (g - 1) / (k - 1)
    outer = (k - 1) / (d - 1)
    variance = outer * (summation + inner * var_ej)
    mean = means.mean(2, keepdims=True)                          # means.mean(0)
    denom = 1.0 / np.sqrt(variance + eps)
    if mean_center:
        h = (shards - mean) * denom
    else:
        h = shards * denom
    out = np.asarray(w).reshape(1, 1, g, k) * h
    if use_bias:
        out = out + np.asarray(b).reshape(1, 1, g, k)
    return out.reshape(B, S, H)


if __name__ == "__main__":
    # Small shapes: batch=2, seq=8, mp_size=2, partition_size=16 -> hidden_full=32
    B, S = 2, 8
    mp_size = 2
    partition = 16
    H = mp_size * partition
    eps = 1e-5

    key = jax.random.PRNGKey(0)
    kx, kw, kb = jax.random.split(key, 3)
    x = jax.random.normal(kx, (B, S, H), dtype=jnp.float32)
    # Parameters: one (partition,) weight/bias per emulated worker, concatenated.
    weight_full = jax.random.normal(kw, (H,), dtype=jnp.float32)
    bias_full = jax.random.normal(kb, (H,), dtype=jnp.float32) * 0.1

    # use_bias=True, mean_center=True
    out = synced_model_parallel_fused_layer_norm(
        x, weight_full, bias_full, mp_size=mp_size, eps=eps,
        mean_center=True, use_bias=True,
    )
    out = jax.block_until_ready(out)
    ref = _reference(np.array(x), np.array(weight_full), np.array(bias_full),
                     mp_size, eps, True, True)
    np.testing.assert_allclose(np.array(out), ref, rtol=1e-5, atol=1e-5)

    # use_bias=False, mean_center=False (exercises the no-bias kernel path)
    out2 = synced_model_parallel_fused_layer_norm(
        x, weight_full, None, mp_size=mp_size, eps=eps,
        mean_center=False, use_bias=False,
    )
    out2 = jax.block_until_ready(out2)
    ref2 = _reference(np.array(x), np.array(weight_full), None,
                      mp_size, eps, False, False)
    np.testing.assert_allclose(np.array(out2), ref2, rtol=1e-5, atol=1e-5)

    print("KERNEL_OK")
</pallas_src>

<mosaic_0001>
module attributes {stable_mosaic.version = 11 : i64} {
  func.func @_ln_kernel_bias(%arg0: i32, %arg1: memref<16x32xf32, #tpu.memory_space<vmem>>, %arg2: memref<1x32xf32, #tpu.memory_space<vmem>>, %arg3: memref<1x32xf32, #tpu.memory_space<vmem>>, %arg4: memref<16x32xf32, #tpu.memory_space<vmem>>) attributes {dimension_semantics = [#tpu.dimension_semantics<parallel>], iteration_bounds = array<i64: 1>, scalar_prefetch = 0 : i64, scratch_operands = 0 : i64, tpu.core_type = #tpu.core_type<tc>, window_params = [{transform_indices = @transform_0, window_bounds = array<i64: 16, 32>}, {pipeline_mode = #tpu.pipeline_mode<synchronous>, transform_indices = @transform_1, window_bounds = array<i64: 1, 32>}, {pipeline_mode = #tpu.pipeline_mode<synchronous>, transform_indices = @transform_2, window_bounds = array<i64: 1, 32>}, {transform_indices = @transform_3, window_bounds = array<i64: 16, 32>}]} {
    %c0 = arith.constant 0 : index
    %c0_0 = arith.constant 0 : index
    %0 = vector.load %arg1[%c0, %c0_0] : memref<16x32xf32, #tpu.memory_space<vmem>>, vector<16x32xf32>
    %cst = arith.constant dense<0.000000e+00> : vector<16xf32>
    %1 = vector.multi_reduction <add>, %0, %cst [1] : vector<16x32xf32> to vector<16xf32>
    %2 = vector.shape_cast %1 : vector<16xf32> to vector<16x1xf32>
    %cst_1 = arith.constant 3.200000e+01 : f32
    %3 = vector.broadcast %cst_1 : f32 to vector<16x1xf32>
    %4 = arith.divf %2, %3 : vector<16x1xf32>
    %5 = vector.broadcast %4 : vector<16x1xf32> to vector<16x32xf32>
    %6 = arith.subf %0, %5 : vector<16x32xf32>
    %7 = arith.mulf %6, %6 : vector<16x32xf32>
    %cst_2 = arith.constant dense<0.000000e+00> : vector<16xf32>
    %8 = vector.multi_reduction <add>, %7, %cst_2 [1] : vector<16x32xf32> to vector<16xf32>
    %9 = vector.shape_cast %8 : vector<16xf32> to vector<16x1xf32>
    %cst_3 = arith.constant 0.0322580636 : f32
    %10 = vector.broadcast %cst_3 : f32 to vector<16x1xf32>
    %11 = arith.mulf %9, %10 : vector<16x1xf32>
    %cst_4 = arith.constant 9.99999974E-6 : f32
    %12 = vector.broadcast %cst_4 : f32 to vector<16x1xf32>
    %13 = arith.addf %11, %12 : vector<16x1xf32>
    %14 = math.rsqrt %13 : vector<16x1xf32>
    %15 = vector.broadcast %14 : vector<16x1xf32> to vector<16x32xf32>
    %16 = arith.mulf %6, %15 : vector<16x32xf32>
    %c0_5 = arith.constant 0 : index
    %c0_6 = arith.constant 0 : index
    %17 = vector.load %arg2[%c0_5, %c0_6] : memref<1x32xf32, #tpu.memory_space<vmem>>, vector<1x32xf32>
    %18 = vector.broadcast %17 : vector<1x32xf32> to vector<16x32xf32>
    %19 = arith.mulf %18, %16 : vector<16x32xf32>
    %c0_7 = arith.constant 0 : index
    %c0_8 = arith.constant 0 : index
    %20 = vector.load %arg3[%c0_7, %c0_8] : memref<1x32xf32, #tpu.memory_space<vmem>>, vector<1x32xf32>
    %21 = vector.broadcast %20 : vector<1x32xf32> to vector<16x32xf32>
    %22 = arith.addf %19, %21 : vector<16x32xf32>
    %c0_9 = arith.constant 0 : index
    %c0_10 = arith.constant 0 : index
    %23 = vector.load %arg4[%c0_9, %c0_10] : memref<16x32xf32, #tpu.memory_space<vmem>>, vector<16x32xf32>
    tpu.vector_store %arg4[%c0_9, %c0_10], %22 {strides = array<i32>} : memref<16x32xf32, #tpu.memory_space<vmem>>, vector<16x32xf32>,
    return
  }
  func.func @transform_0(%arg0: i32) -> (i32, i32) {
    %c0_i32 = arith.constant 0 : i32
    %c0_i32_0 = arith.constant 0 : i32
    return %arg0, %c0_i32 : i32, i32
  }
  func.func @transform_1(%arg0: i32) -> (i32, i32) {
    %c0_i32 = arith.constant 0 : i32
    %c0_i32_0 = arith.constant 0 : i32
    %c0_i32_1 = arith.constant 0 : i32
    return %c0_i32, %c0_i32_0 : i32, i32
  }
  func.func @transform_2(%arg0: i32) -> (i32, i32) {
    %c0_i32 = arith.constant 0 : i32
    %c0_i32_0 = arith.constant 0 : i32
    %c0_i32_1 = arith.constant 0 : i32
    return %c0_i32, %c0_i32_0 : i32, i32
  }
  func.func @transform_3(%arg0: i32) -> (i32, i32) {
    %c0_i32 = arith.constant 0 : i32
    %c0_i32_0 = arith.constant 0 : i32
    return %arg0, %c0_i32 : i32, i32
  }
}

</mosaic_0001>

<bundles_post_ra>
// kernel: tpu_custom_call.1
= control target key start
LH: loop header
LB: loop body
LE: loop exit
PB: predicated region body
PF: predicated region fallthrough
CT: control target
= control target key end

     0   :  { %8 = vsyncpa [#allocation3], 0  ;;  %s198_s0 = inlined_call_operand.hbm [shape: f32[16,32], index: 0, kind: input, shape index: {}]   ;;  %s199_s1 = inlined_call_operand.vmem [shape: f32[1,32], index: 1, kind: input, shape index: {}]   ;;  %s200_s2 = inlined_call_operand.vmem [shape: f32[1,32], index: 2, kind: input, shape index: {}]   ;;  %s201_s3 = inlined_call_operand.hbm [shape: f32[16,32], index: 3, kind: output, shape index: {}]  }
   0x1   :  { %9 = vsyncpa [#allocation4], 0  ;;  %s150_s12 = smov [#allocation2]  }
   0x2   :  { %s15_s13 = sshll.u32 %s150_s12, 4  ;;  %s16_s13 = int_to_ptr.vmem [resolvable:$true] %s15_s13 }
   0x3   :  { %s114_s14 = scalar_lea.vmem %s16_s13, 256  ;;  %p119_p1 = scmp.lt.s32.totalorder %s16_s13, %s16_s13 }
   0x4   :  { %p115_p0 = scmp.ne.s32.totalorder %s16_s13, %s114_s14  ;;  %p120_p2 = scmp.lt.s32.totalorder %s114_s14, %s114_s14 }
   0x6   :  { %p121_p3 = por %p120_p2, %p119_p1 }
   0x8   :  { %p122_p4 = pnand %p121_p3, %p115_p0 }
   0xa   :  { %125 = shalt.err (!%p122_p4)
}
   0xb   :  { %s151_s15 = smov 128   ;;  %s152_s16 = smov 8  }
   0xc   :  { %21 = dma.hbm_to_vmem [thread:$0]  %s198_s0, 256, %s16_s13, [#allocation3], %s151_s15, %s151_s15, %s152_s16  }
   0xd   :  { %146 = dma.done.wait [#allocation3], 256  }
   0xe   :  { %147 = vsyncadd [#allocation3], 4294967040  ;;  %vm31_vm0 = vcmask 261120   ;;  %v29_v0 = vld [vmem:[#allocation2] sm:$0xff]  ;;  %v30_v1 = vld [vmem:[#allocation2 + $0x8] sm:$0xff]  ;;  %s153_s22 = smov [#allocation5]  }
   0xf   :  { %v32_v2 = vsel %vm31_vm0, %v29_v0, 0.0  ;;  %v35_v3 = vsel %vm31_vm0, %v30_v1, 0.0  ;;  %v96_v21 = vld [vmem:[%s199_s1] ss:$0 sm:$0xff]  ;;  %s84_s23 = sshll.u32 %s153_s22, 4  ;;  %s85_s23 = int_to_ptr.vmem [resolvable:$true] %s84_s23 }
  0x10   :  { %33 = vadd.xlane.f32.xlu0 %v32_v2  ;;  %v97_v23 = vld [vmem:[%s200_s2] ss:$0 sm:$0xff]  ;;  %s126_s24 = scalar_lea.vmem %s85_s23, 256  ;;  %p131_p6 = scmp.lt.s32.totalorder %s85_s23, %s85_s23 }
  0x11   :  { %p127_p5 = scmp.ne.s32.totalorder %s85_s23, %s126_s24  ;;  %p132_p7 = scmp.lt.s32.totalorder %s126_s24, %s126_s24 }
  0x13   :  { %p133_p8 = por %p132_p7, %p131_p6 }
  0x14   :  { %36 = vadd.xlane.f32.xlu0 %v35_v3 }
  0x15   :  { %p134_p9 = pnand %p133_p8, %p127_p5 }
  0x99   :  { %v34_v4 = vpop.xlane.xlu0 %33 }
  0x9a   :  { %v39_v5 = vmul.f32 0.03125, %v34_v4 }
  0x9c   :  { %v41_v6 = vsub.f32 %v29_v0, %v39_v5 }
  0x9d   :  { %v37_v7 = vpop.xlane.xlu0 %36 }
  0x9e   :  { %v40_v8 = vmul.f32 0.03125, %v37_v7  ;;  %v43_v9 = vmul.f32 %v41_v6, %v41_v6 }
  0xa0   :  { %v42_v10 = vsub.f32 %v30_v1, %v40_v8  ;;  %v45_v11 = vsel %vm31_vm0, %v43_v9, 0.0 }
  0xa1   :  { %46 = vadd.xlane.f32.xlu1 %v45_v11 }
  0xa2   :  { %v44_v12 = vmul.f32 %v42_v10, %v42_v10 }
  0xa4   :  { %v48_v13 = vsel %vm31_vm0, %v44_v12, 0.0 }
  0xa5   :  { %49 = vadd.xlane.f32.xlu1 %v48_v13 }
 0x12a   :  { %v47_v14 = vpop.xlane.xlu1 %46 }
 0x12b   :  { %v51_v15 = vmul.f32 0.032258064, %v47_v14 }
 0x12d   :  { %v53_v16 = vadd.f32 1e-05, %v51_v15 }
 0x12e   :  { %v50_v17 = vpop.xlane.xlu1 %49 }
 0x12f   :  { %102 = vrsqrt.f32 %v53_v16  ;;  %v52_v18 = vmul.f32 0.032258064, %v50_v17 }
 0x131   :  { %v54_v19 = vadd.f32 1e-05, %v52_v18 }
 0x133   :  { %104 = vrsqrt.f32 %v54_v19 }
 0x13c   :  { %v103_v20 = vpop.eup %102 }
 0x13d   :  { %v57_v22 = vmul.f32 %v103_v20, %v41_v6 }
 0x13f   :  { %v66_v24 = vmul.f32 %v96_v21, %v57_v22 }
 0x140   :  { %v105_v25 = vpop.eup %104 }
 0x141   :  { %v58_v26 = vmul.f32 %v105_v25, %v42_v10  ;;  %v75_v27 = vadd.f32 %v97_v23, %v66_v24 }
 0x143   :  { %v67_v28 = vmul.f32 %v96_v21, %v58_v26  ;;  %77 = vst.msk [vmem:[#allocation5] sm:$0xff] %vm31_vm0, %v75_v27 }
 0x145   :  { %v76_v29 = vadd.f32 %v97_v23, %v67_v28 }
 0x147   :  { %78 = vst.msk [vmem:[#allocation5 + $0x8] sm:$0xff] %vm31_vm0, %v76_v29 }
 0x148   :  { %137 = shalt.err (!%p134_p9)
}
 0x149   :  { %90 = dma.vmem_to_hbm [thread:$0]  %s85_s23, 256, %s201_s3, [#allocation4], %s151_s15, %s151_s15, %s152_s16  }
 0x14a   :  { %148 = dma.done.wait [#allocation4], 256  }
 0x14b   :  { %149 = vsyncadd [#allocation4], 4294967040 }
 0x14c   :  { %94 = vsyncpa [#allocation3], 1 }
 0x14d   :  { %95 = vsyncpa [#allocation4], 1 }

</bundles_post_ra>
